<compile_context>
chip_gen: v7x
topology: tpu7x:2x2x1
jax: 0.10.0
libtpu: 0.0.40
codegen_flags: <defaults>
</compile_context>

<pallas_src>
import math
from typing import NamedTuple

import jax
import jax.numpy as jnp
from jax.experimental import pallas as pl
from jax.experimental.pallas import tpu as pltpu


def _round_up(x, m):
    return ((x + m - 1) // m) * m


def _pad_to(arr, shape):
    pads = [(0, s - d) for d, s in zip(arr.shape, shape)]
    return jnp.pad(arr, pads)


# Keep the resident W2 tile comfortably under v5e's 16 MiB scoped-VMEM default
# (and half of v7x's 32 MiB), leaving room for W1, biases, h scratch and the
# double-buffered out/t tiles.  Larger W2 switches to the N-tiled path.
_W2_RESIDENT_BUDGET_BYTES = 8 * 1024 * 1024


class PreparedTimestepParams(NamedTuple):
    freq: jax.Array     # [1, K_pad] f32
    w1_sin: jax.Array   # [K_pad, H_pad] weight_dtype
    w1_cos: jax.Array   # [K_pad, H_pad] weight_dtype
    b1: jax.Array       # [1, H_pad] f32
    w2: jax.Array       # [H_pad, O_pad] weight_dtype
    b2: jax.Array       # [1, O_pad] f32
    embedding_dim: int
    hidden_dim: int
    output_dim: int
    K_pad: int
    H_pad: int
    O_pad: int
    TN: int             # output-dim tile (== O_pad when W2 stays resident)


def prepare_timestep_params(params, embedding_dim, *, weight_dtype=jnp.bfloat16):
    """One-time weight preparation.  Call at parameter-init time and reuse.

    Hoists all pad/cast/split work out of the per-step path so the kernel's
    HBM traffic is just the prepared weights (+ timesteps / output).
    """
    w1, b1, w2, b2 = params            # w1:[E,H] b1:[H] w2:[H,O] b2:[O]
    hidden_dim = w1.shape[1]
    output_dim = w2.shape[1]

    half_dim = embedding_dim // 2
    # Deliberate deviation: PyTorch divides by zero for embedding_dim == 2
    # (inf/nan embeddings); we guard with max(half_dim - 1, 1).
    scale = math.log(10000.0) / max(half_dim - 1, 1)
    freq = jnp.exp(jnp.arange(half_dim, dtype=jnp.float32) * -scale)

    itemsize = jnp.dtype(weight_dtype).itemsize
    sublane = 8 * (4 // itemsize)                    # 8 for f32, 16 for bf16
    K_pad = _round_up(max(half_dim, 1), sublane)     # zero-padded K (exact)
    H_pad = _round_up(hidden_dim, 128)               # lane-dense hidden

    # Output-dim tiling decision: keep W2 resident when small enough,
    # otherwise tile it along N (TN multiple of 256) so it still fits VMEM
    # (critical on v7x's 64 MiB physical / 32 MiB scoped default).
    w2_resident_bytes = H_pad * _round_up(output_dim, 128) * itemsize
    if w2_resident_bytes <= _W2_RESIDENT_BUDGET_BYTES:
        O_pad = _round_up(output_dim, 128)
        TN = O_pad
    else:
        TN = 512
        O_pad = _round_up(output_dim, TN)
    # TODO(synk): extremely large hidden_dim would also want K/H tiling of W1;
    # not needed for typical diffusion time-embedding sizes.

    freq_p = _pad_to(freq[None, :], (1, K_pad))
    # Split W1 into sin/cos halves (removes the lane-axis concat).  For odd
    # embedding_dim the PyTorch zero-pad column hits w1[-1, :] and contributes
    # zero, so dropping rows past 2*half_dim is exact.  Extra zero K rows are
    # exact too: sin(0)=0 and cos(0)*0-row = 0.
    w1_sin = _pad_to(w1[:half_dim, :], (K_pad, H_pad)).astype(weight_dtype)
    w1_cos = _pad_to(w1[half_dim:2 * half_dim, :],
                     (K_pad, H_pad)).astype(weight_dtype)
    b1_p = _pad_to(b1.reshape(1, hidden_dim), (1, H_pad)).astype(jnp.float32)
    w2_p = _pad_to(w2, (H_pad, O_pad)).astype(weight_dtype)
    b2_p = _pad_to(b2.reshape(1, output_dim), (1, O_pad)).astype(jnp.float32)

    return PreparedTimestepParams(freq_p, w1_sin, w1_cos, b1_p, w2_p, b2_p,
                                  embedding_dim, hidden_dim, output_dim,
                                  K_pad, H_pad, O_pad, TN)


def timestep_embedding_kernel(t_ref, freq_ref, w1s_ref, w1c_ref, b1_ref,
                              w2_ref, b2_ref, out_ref, h_ref):
    # t_ref:    [TB, 1]        f32 (flattened timesteps, cast to float)
    # freq_ref: [1, K_pad]     f32 sinusoidal frequencies (zero-padded)
    # w1s_ref:  [K_pad, H_pad] sin half of W1 (weight dtype)
    # w1c_ref:  [K_pad, H_pad] cos half of W1
    # b1_ref:   [1, H_pad]     f32
    # w2_ref:   [H_pad, TN]    weight dtype (full O_pad when resident)
    # b2_ref:   [1, TN]        f32
    # out_ref:  [TB, TN]
    # h_ref:    [TB, H_pad]    f32 VMEM scratch (reused across the N tiles)
    @pl.when(pl.program_id(1) == 0)
    def _compute_hidden():
        t = t_ref[...]                       # [TB, 1]
        emb = t * freq_ref[...]              # [TB, K_pad] broadcast outer prod
        s = jnp.sin(emb)
        c = jnp.cos(emb)
        wdt = w1s_ref.dtype
        h = (jnp.dot(s.astype(wdt), w1s_ref[...],
                     preferred_element_type=jnp.float32)
             + jnp.dot(c.astype(wdt), w1c_ref[...],
                       preferred_element_type=jnp.float32)
             + b1_ref[...])
        h_ref[...] = jnp.maximum(h, 0.0)     # ReLU, f32

    o = jnp.dot(h_ref[...].astype(w2_ref.dtype), w2_ref[...],
                preferred_element_type=jnp.float32)
    out_ref[...] = (o + b2_ref[...]).astype(out_ref.dtype)


def _spec(shape, index_map, mode=None):
    if mode is None:
        return pl.BlockSpec(shape, index_map)
    return pl.BlockSpec(shape, index_map, pipeline_mode=mode)


def timestep_embedding(timesteps, prep: PreparedTimestepParams, *,
                       out_dtype=jnp.float32):
    """timesteps: int array of any shape (flattened, like torch .flatten())."""
    # int32 -> float32 is exact for typical diffusion timesteps (< 2^24).
    t = timesteps.reshape(-1).astype(jnp.float32)[:, None]          # [B, 1]
    batch = t.shape[0]

    K_pad, H_pad, O_pad, TN = prep.K_pad, prep.H_pad, prep.O_pad, prep.TN

    # Batch tiling: small batches run as one block; large batches get a
    # parallel grid (v7x's two TensorCores split it).  512-wide tiles keep the
    # per-step overhead small and the output stores lane/sublane-dense.
    if batch <= 512:
        TB = _round_up(batch, 8)
    else:
        TB = 512
    B_pad = _round_up(batch, TB)
    t_p = _pad_to(t, (B_pad, 1))

    num_i = B_pad // TB
    num_j = O_pad // TN

    # Constant-index_map blocks are single-buffered (half the weight VMEM).
    resident = pl.Buffered(1)
    # W2/b2 may only be single-buffered when they do NOT vary with j.
    w2_mode = pl.Buffered(1) if num_j == 1 else None

    out = pl.pallas_call(
        timestep_embedding_kernel,
        out_shape=jax.ShapeDtypeStruct((B_pad, O_pad), out_dtype),
        grid=(num_i, num_j),
        in_specs=[
            _spec((TB, 1), lambda i, j: (i, 0)),                       # t tile
            _spec((1, K_pad), lambda i, j: (0, 0), resident),          # freqs
            _spec((K_pad, H_pad), lambda i, j: (0, 0), resident),      # W1 sin
            _spec((K_pad, H_pad), lambda i, j: (0, 0), resident),      # W1 cos
            _spec((1, H_pad), lambda i, j: (0, 0), resident),          # b1
            _spec((H_pad, TN), lambda i, j: (0, j), w2_mode),          # W2
            _spec((1, TN), lambda i, j: (0, j), w2_mode),              # b2
        ],
        out_specs=pl.BlockSpec((TB, TN), lambda i, j: (i, j)),
        scratch_shapes=[pltpu.VMEM((TB, H_pad), jnp.float32)],         # h
        compiler_params=pltpu.CompilerParams(
            dimension_semantics=("parallel", "arbitrary")),
    )(t_p, prep.freq, prep.w1_sin, prep.w1_cos, prep.b1, prep.w2, prep.b2)
    return out[:batch, :prep.output_dim]


def reference(timesteps, params, embedding_dim):
    w1, b1, w2, b2 = params
    t = timesteps.reshape(-1).astype(jnp.float32)
    half_dim = embedding_dim // 2
    scale = math.log(10000.0) / max(half_dim - 1, 1)
    freq = jnp.exp(jnp.arange(half_dim, dtype=jnp.float32) * -scale)
    emb = t[:, None] * freq[None, :]
    temb = jnp.concatenate([jnp.sin(emb), jnp.cos(emb)], axis=1)
    if embedding_dim % 2 == 1:
        temb = jnp.pad(temb, ((0, 0), (0, 1)))
    h = jnp.maximum(temb @ w1 + b1, 0.0)
    return h @ w2 + b2


if __name__ == "__main__":
    embedding_dim = 32
    hidden_dim = 64
    output_dim = 32
    batch = 8

    key = jax.random.PRNGKey(0)
    k_t, k_w1, k_b1, k_w2, k_b2 = jax.random.split(key, 5)

    # Deterministic parameter init (shapes from the nn.Linear layers).
    w1 = (jax.random.normal(k_w1, (embedding_dim, hidden_dim), jnp.float32)
          / math.sqrt(embedding_dim))
    b1 = jax.random.normal(k_b1, (hidden_dim,), jnp.float32) * 0.01
    w2 = (jax.random.normal(k_w2, (hidden_dim, output_dim), jnp.float32)
          / math.sqrt(hidden_dim))
    b2 = jax.random.normal(k_b2, (output_dim,), jnp.float32) * 0.01
    params = (w1, b1, w2, b2)

    # Integer timesteps (LongTensor analogue).
    timesteps = jax.random.randint(k_t, (batch,), 0, 1000, dtype=jnp.int32)

    ref = reference(timesteps, params, embedding_dim)

    # f32 weights: exact match against the reference.
    prep_f32 = prepare_timestep_params(params, embedding_dim,
                                       weight_dtype=jnp.float32)
    out = jax.block_until_ready(timestep_embedding(timesteps, prep_f32))
    assert out.shape == (batch, output_dim)
    assert jnp.allclose(out, ref, atol=1e-4, rtol=1e-4), "mismatch vs reference"

    # Default path: bf16 weights (weight-bandwidth / MXU win on all gens).
    prep_bf16 = prepare_timestep_params(params, embedding_dim)
    out_bf16 = jax.block_until_ready(timestep_embedding(timesteps, prep_bf16))
    assert out_bf16.shape == (batch, output_dim)
    assert jnp.allclose(out_bf16, ref, atol=3e-2, rtol=3e-2), "bf16 mismatch"

    print("KERNEL_OK")
</pallas_src>

<mosaic_0001>
module attributes {stable_mosaic.version = 11 : i64} {
  func.func @timestep_embedding_kernel(%arg0: i32, %arg1: i32, %arg2: memref<8x1xf32, #tpu.memory_space<vmem>>, %arg3: memref<1x16xf32, #tpu.memory_space<vmem>>, %arg4: memref<16x128xf32, #tpu.memory_space<vmem>>, %arg5: memref<16x128xf32, #tpu.memory_space<vmem>>, %arg6: memref<1x128xf32, #tpu.memory_space<vmem>>, %arg7: memref<128x128xf32, #tpu.memory_space<vmem>>, %arg8: memref<1x128xf32, #tpu.memory_space<vmem>>, %arg9: memref<8x128xf32, #tpu.memory_space<vmem>>, %arg10: memref<8x128xf32, #tpu.memory_space<vmem>>) attributes {dimension_semantics = [#tpu.dimension_semantics<parallel>, #tpu.dimension_semantics<arbitrary>], iteration_bounds = array<i64: 1, 1>, scalar_prefetch = 0 : i64, scratch_operands = 1 : i64, tpu.core_type = #tpu.core_type<tc>, window_params = [{transform_indices = @transform_0, window_bounds = array<i64: 8, 1>}, {pipeline_mode = #tpu.pipeline_mode<synchronous>, transform_indices = @transform_1, window_bounds = array<i64: 1, 16>}, {pipeline_mode = #tpu.pipeline_mode<synchronous>, transform_indices = @transform_2, window_bounds = array<i64: 16, 128>}, {pipeline_mode = #tpu.pipeline_mode<synchronous>, transform_indices = @transform_3, window_bounds = array<i64: 16, 128>}, {pipeline_mode = #tpu.pipeline_mode<synchronous>, transform_indices = @transform_4, window_bounds = array<i64: 1, 128>}, {pipeline_mode = #tpu.pipeline_mode<synchronous>, transform_indices = @transform_5, window_bounds = array<i64: 128, 128>}, {pipeline_mode = #tpu.pipeline_mode<synchronous>, transform_indices = @transform_6, window_bounds = array<i64: 1, 128>}, {transform_indices = @transform_7, window_bounds = array<i64: 8, 128>}]} {
    %c0_i32 = arith.constant 0 : i32
    %0 = arith.cmpi eq, %arg1, %c0_i32 : i32
    %1 = arith.extui %0 : i1 to i32
    %c0_i32_0 = arith.constant 0 : i32
    %2 = arith.cmpi ne, %1, %c0_i32_0 : i32
    scf.if %2 {
      %c0_8 = arith.constant 0 : index
      %c0_9 = arith.constant 0 : index
      %10 = vector.load %arg2[%c0_8, %c0_9] : memref<8x1xf32, #tpu.memory_space<vmem>>, vector<8x1xf32>
      %c0_10 = arith.constant 0 : index
      %c0_11 = arith.constant 0 : index
      %11 = vector.load %arg3[%c0_10, %c0_11] : memref<1x16xf32, #tpu.memory_space<vmem>>, vector<1x16xf32>
      %12 = vector.broadcast %10 : vector<8x1xf32> to vector<8x16xf32>
      %13 = vector.broadcast %11 : vector<1x16xf32> to vector<8x16xf32>
      %14 = arith.mulf %12, %13 : vector<8x16xf32>
      %15 = math.sin %14 : vector<8x16xf32>
      %16 = math.cos %14 : vector<8x16xf32>
      %c0_12 = arith.constant 0 : index
      %c0_13 = arith.constant 0 : index
      %17 = vector.load %arg4[%c0_12, %c0_13] : memref<16x128xf32, #tpu.memory_space<vmem>>, vector<16x128xf32>
      %cst_14 = arith.constant dense<0.000000e+00> : vector<8x128xf32>
      %18 = tpu.matmul %15, %17, %cst_14 {dimension_numbers = #tpu.dot_dimension_numbers<[1], [0], [0], [1], [0, 0, 1, 1], [], []>} : vector<8x16xf32>, vector<16x128xf32>, vector<8x128xf32> -> vector<8x128xf32>
      %c0_15 = arith.constant 0 : index
      %c0_16 = arith.constant 0 : index
      %19 = vector.load %arg5[%c0_15, %c0_16] : memref<16x128xf32, #tpu.memory_space<vmem>>, vector<16x128xf32>
      %cst_17 = arith.constant dense<0.000000e+00> : vector<8x128xf32>
      %20 = tpu.matmul %16, %19, %cst_17 {dimension_numbers = #tpu.dot_dimension_numbers<[1], [0], [0], [1], [0, 0, 1, 1], [], []>} : vector<8x16xf32>, vector<16x128xf32>, vector<8x128xf32> -> vector<8x128xf32>
      %21 = arith.addf %18, %20 : vector<8x128xf32>
      %c0_18 = arith.constant 0 : index
      %c0_19 = arith.constant 0 : index
      %22 = vector.load %arg6[%c0_18, %c0_19] : memref<1x128xf32, #tpu.memory_space<vmem>>, vector<1x128xf32>
      %23 = vector.broadcast %22 : vector<1x128xf32> to vector<8x128xf32>
      %24 = arith.addf %21, %23 : vector<8x128xf32>
      %cst_20 = arith.constant 0.000000e+00 : f32
      %25 = vector.broadcast %cst_20 : f32 to vector<8x128xf32>
      %26 = arith.maximumf %24, %25 : vector<8x128xf32>
      %c0_21 = arith.constant 0 : index
      %c0_22 = arith.constant 0 : index
      %27 = vector.load %arg10[%c0_21, %c0_22] : memref<8x128xf32, #tpu.memory_space<vmem>>, vector<8x128xf32>
      tpu.vector_store %arg10[%c0_21, %c0_22], %26 {strides = array<i32>} : memref<8x128xf32, #tpu.memory_space<vmem>>, vector<8x128xf32>,
    } else {
    }
    %c0 = arith.constant 0 : index
    %c0_1 = arith.constant 0 : index
    %3 = vector.load %arg10[%c0, %c0_1] : memref<8x128xf32, #tpu.memory_space<vmem>>, vector<8x128xf32>
    %c0_2 = arith.constant 0 : index
    %c0_3 = arith.constant 0 : index
    %4 = vector.load %arg7[%c0_2, %c0_3] : memref<128x128xf32, #tpu.memory_space<vmem>>, vector<128x128xf32>
    %cst = arith.constant dense<0.000000e+00> : vector<8x128xf32>
    %5 = tpu.matmul %3, %4, %cst {dimension_numbers = #tpu.dot_dimension_numbers<[1], [0], [0], [1], [0, 0, 1, 1], [], []>} : vector<8x128xf32>, vector<128x128xf32>, vector<8x128xf32> -> vector<8x128xf32>
    %c0_4 = arith.constant 0 : index
    %c0_5 = arith.constant 0 : index
    %6 = vector.load %arg8[%c0_4, %c0_5] : memref<1x128xf32, #tpu.memory_space<vmem>>, vector<1x128xf32>
    %7 = vector.broadcast %6 : vector<1x128xf32> to vector<8x128xf32>
    %8 = arith.addf %5, %7 : vector<8x128xf32>
    %c0_6 = arith.constant 0 : index
    %c0_7 = arith.constant 0 : index
    %9 = vector.load %arg9[%c0_6, %c0_7] : memref<8x128xf32, #tpu.memory_space<vmem>>, vector<8x128xf32>
    tpu.vector_store %arg9[%c0_6, %c0_7], %8 {strides = array<i32>} : memref<8x128xf32, #tpu.memory_space<vmem>>, vector<8x128xf32>,
    return
  }
  func.func @transform_0(%arg0: i32, %arg1: i32) -> (i32, i32) {
    %c0_i32 = arith.constant 0 : i32
    %c0_i32_0 = arith.constant 0 : i32
    return %arg0, %c0_i32 : i32, i32
  }
  func.func @transform_1(%arg0: i32, %arg1: i32) -> (i32, i32) {
    %c0_i32 = arith.constant 0 : i32
    %c0_i32_0 = arith.constant 0 : i32
    %c0_i32_1 = arith.constant 0 : i32
    return %c0_i32, %c0_i32_0 : i32, i32
  }
  func.func @transform_2(%arg0: i32, %arg1: i32) -> (i32, i32) {
    %c0_i32 = arith.constant 0 : i32
    %c0_i32_0 = arith.constant 0 : i32
    %c0_i32_1 = arith.constant 0 : i32
    return %c0_i32, %c0_i32_0 : i32, i32
  }
  func.func @transform_3(%arg0: i32, %arg1: i32) -> (i32, i32) {
    %c0_i32 = arith.constant 0 : i32
    %c0_i32_0 = arith.constant 0 : i32
    %c0_i32_1 = arith.constant 0 : i32
    return %c0_i32, %c0_i32_0 : i32, i32
  }
  func.func @transform_4(%arg0: i32, %arg1: i32) -> (i32, i32) {
    %c0_i32 = arith.constant 0 : i32
    %c0_i32_0 = arith.constant 0 : i32
    %c0_i32_1 = arith.constant 0 : i32
    return %c0_i32, %c0_i32_0 : i32, i32
  }
  func.func @transform_5(%arg0: i32, %arg1: i32) -> (i32, i32) {
    %c0_i32 = arith.constant 0 : i32
    %c0_i32_0 = arith.constant 0 : i32
    return %c0_i32, %arg1 : i32, i32
  }
  func.func @transform_6(%arg0: i32, %arg1: i32) -> (i32, i32) {
    %c0_i32 = arith.constant 0 : i32
    %c0_i32_0 = arith.constant 0 : i32
    return %c0_i32, %arg1 : i32, i32
  }
  func.func @transform_7(%arg0: i32, %arg1: i32) -> (i32, i32) {
    %c0_i32 = arith.constant 0 : i32
    return %arg0, %arg1 : i32, i32
  }
}

</mosaic_0001>

<bundles_post_ra>
// kernel: tpu_custom_call.1
= control target key start
LH: loop header
LB: loop body
LE: loop exit
PB: predicated region body
PF: predicated region fallthrough
CT: control target
= control target key end

     0   :  { %12 = vsyncpa [#allocation4], 0  ;;  %s961_s0 = inlined_call_operand.vmem [shape: f32[8,1], index: 0, kind: input, shape index: {}]   ;;  %s962_s1 = inlined_call_operand.hbm [shape: f32[1,16], index: 1, kind: input, shape index: {}]   ;;  %s963_s2 = inlined_call_operand.vmem [shape: f32[16,128], index: 2, kind: input, shape index: {}]   ;;  %s964_s3 = inlined_call_operand.hbm [shape: f32[16,128], index: 3, kind: input, shape index: {}]   ;;  %s965_s4 = inlined_call_operand.vmem [shape: f32[1,128], index: 4, kind: input, shape index: {}]   ;;  %s966_s5 = inlined_call_operand.hbm [shape: f32[128,128], index: 5, kind: input, shape index: {}]   ;;  %s967_s6 = inlined_call_operand.vmem [shape: f32[1,128], index: 6, kind: input, shape index: {}]   ;;  %s968_s7 = inlined_call_operand.hbm [shape: f32[8,128], index: 7, kind: output, shape index: {}]  }
   0x1   :  { %13 = vsyncpa [#allocation7], 0 }
   0x2   :  { %14 = vsyncpa [#allocation5], 0  ;;  %s797_s24 = smov [#allocation6]   ;;  %s703_s28 = scalar_lea.hbm %s964_s3, 256 }
   0x3   :  { %s34_s25 = sshll.u32 %s797_s24, 4  ;;  %p704_p0 = scmp.ne.s32.totalorder %s964_s3, %s703_s28  ;;  %s35_s25 = int_to_ptr.vmem [resolvable:$true] %s34_s25 }
   0x4   :  { %p707_p1 = scmp.lt.u32.totalorder %s703_s28, %s964_s3 }
   0x6   :  { %p709_p2 = pnand %p707_p1, %p704_p0 }
   0x8   :  { %712 = shalt.err (!%p709_p2)
}
   0x9   :  { %s713_s10 = scalar_lea.vmem %s35_s25, 256  ;;  %p718_p4 = scmp.lt.s32.totalorder %s35_s25, %s35_s25 }
   0xa   :  { %p714_p3 = scmp.ne.s32.totalorder %s35_s25, %s713_s10  ;;  %p719_p5 = scmp.lt.s32.totalorder %s713_s10, %s713_s10 }
   0xc   :  { %p720_p6 = por %p719_p5, %p718_p4 }
   0xe   :  { %p721_p7 = pnand %p720_p6, %p714_p3 }
  0x10   :  { %724 = shalt.err (!%p721_p7)
}
  0x11   :  { %s798_s11 = smov 128   ;;  %s799_s12 = smov 8  }
  0x12   :  { %40 = dma.hbm_to_vmem [thread:$0]  %s964_s3, 256, %s35_s25, [#allocation7], %s798_s11, %s798_s11, %s799_s12  }
  0x13   :  { %s800_s15 = smov [#allocation3]   ;;  %s801_s17 = smov [#allocation8]  }
  0x14   :  { %s23_s16 = sshll.u32 %s800_s15, 4  ;;  %s48_s18 = sshll.u32 %s801_s17, 4  ;;  %s24_s16 = int_to_ptr.vmem [resolvable:$true] %s23_s16  ;;  %s49_s18 = int_to_ptr.vmem [resolvable:$true] %s48_s18 }
  0x15   :  { %s725_s21 = scalar_lea.hbm %s962_s1, 16 }
  0x16   :  { %p726_p8 = scmp.ne.s32.totalorder %s962_s1, %s725_s21  ;;  %p729_p9 = scmp.lt.u32.totalorder %s725_s21, %s962_s1 }
  0x18   :  { %p731_p10 = pnand %p729_p9, %p726_p8 }
  0x1a   :  { %734 = shalt.err (!%p731_p10)
}
  0x1b   :  { %s735_s3 = scalar_lea.vmem %s24_s16, 16  ;;  %s739_s25 = scalar_lea.vmem %s24_s16, 32 }
  0x1c   :  { %p736_p11 = scmp.ne.s32.totalorder %s24_s16, %s735_s3  ;;  %p740_p12 = scmp.lt.s32.totalorder %s24_s16, %s24_s16 }
  0x1d   :  { %p741_p13 = scmp.lt.s32.totalorder %s739_s25, %s735_s3 }
  0x1f   :  { %p742_p0 = por %p741_p13, %p740_p12 }
  0x21   :  { %p743_p1 = pnand %p742_p0, %p736_p11 }
  0x23   :  { %746 = shalt.err (!%p743_p1)
}
  0x24   :  { %26 = dma.hbm_to_vmem [thread:$0]  %s962_s1, 16, %s24_s16, [#allocation4]  }
  0x25   :  { %s747_s8 = scalar_lea.hbm %s966_s5, 2048 }
  0x26   :  { %p748_p2 = scmp.ne.s32.totalorder %s966_s5, %s747_s8  ;;  %p751_p3 = scmp.lt.u32.totalorder %s747_s8, %s966_s5 }
  0x28   :  { %p753_p4 = pnand %p751_p3, %p748_p2 }
  0x2a   :  { %756 = shalt.err (!%p753_p4)
}
  0x2b   :  { %s757_s15 = scalar_lea.vmem %s49_s18, 2048  ;;  %p762_p6 = scmp.lt.s32.totalorder %s49_s18, %s49_s18 }
  0x2c   :  { %p758_p5 = scmp.ne.s32.totalorder %s49_s18, %s757_s15  ;;  %p763_p7 = scmp.lt.s32.totalorder %s757_s15, %s757_s15 }
  0x2e   :  { %p764_p8 = por %p763_p7, %p762_p6 }
  0x30   :  { %p765_p9 = pnand %p764_p8, %p758_p5 }
  0x32   :  { %768 = shalt.err (!%p765_p9)
}
  0x33   :  { %54 = dma.hbm_to_vmem [thread:$0]  %s966_s5, 2048, %s49_s18, [#allocation7], %s798_s11, %s798_s11, %s799_s12  }
  0x34   :  { %791 = dma.done.wait [#allocation4], 16  }
  0x35   :  { %792 = vsyncadd [#allocation4], 4294967280 }
  0x36   :  { %793 = dma.done.wait [#allocation7], 2304  }
  0x37   :  { %794 = vsyncadd [#allocation7], 4294964992  ;;  %v802_v0 = vmov 0   ;;  %v70_v1 = vld [vmem:[%s961_s0] sm:$0xff]  ;;  %v294_v3 = vld [vmem:[#allocation6 + $0x8] sm:$0xff]  ;;  %v803_v4 = vmov 0.0|0.0  }
  0x38   :  { %698 = vset.pattern.permute.xlu0 %v802_v0  ;;  %v293_v2 = vld [vmem:[#allocation6] sm:$0xff]  ;;  %648 = vmatprep.subr.bf16.mxu1 %v803_v4  ;;  %vm804_vm0 = vmmov 0   ;;  %v805_v6 = vmov 0.0   ;;  %v453_v7 = vld [vmem:[#allocation8] sm:$0xff]  ;;  %v454_v8 = vld [vmem:[#allocation8 + $0x8] sm:$0xff]  ;;  %vm295_vm11 = vcmask 130048  }
  0x39   :  { %74 = vperm.xlu0 %698, %v70_v1   ;;  %v649_v5 = vpack.c.bf16 %v294_v3, %v293_v2  ;;  %603 = vmatprep.mubr.msk.f32.mxu1 %vm804_vm0, %v805_v6  ;;  %v455_v9 = vld [vmem:[#allocation8 + $0x10] sm:$0xff]  ;;  %v655_v10 = vpack.c.bf16 %v454_v8, %v453_v7  ;;  %v456_v11 = vld [vmem:[#allocation8 + $0x18] sm:$0xff]  ;;  %v457_v13 = vld [vmem:[#allocation8 + $0x20] sm:$0xff]  ;;  %v806_v35 = vmov 683565275   ;;  %s812_s22 = smov [#allocation9]  }
  0x3a   :  { %654 = vmatprep.subr.bf16.mxu0 %v803_v4  ;;  %645 = vmatprep.mubr.msk.f32.mxu0 %vm804_vm0, %v805_v6  ;;  %v658_v12 = vpack.c.bf16 %v456_v11, %v455_v9  ;;  %v458_v14 = vld [vmem:[#allocation8 + $0x28] sm:$0xff]  ;;  %v459_v16 = vld [vmem:[#allocation8 + $0x30] sm:$0xff]  ;;  %v460_v17 = vld [vmem:[#allocation8 + $0x38] sm:$0xff]  ;;  %v807_v37 = vmov 2475754826   ;;  %s553_s23 = sshll.u32 %s812_s22, 4  ;;  %s554_s23 = int_to_ptr.vmem [resolvable:$true] %s553_s23 }
  0x3b   :  { %650 = vmatpush3.bf16.msra.mxu1 %v649_v5  ;;  %656 = vmatpush3.bf16.msra.mxu0 %v655_v10  ;;  %v661_v15 = vpack.c.bf16 %v458_v14, %v457_v13  ;;  %v664_v18 = vpack.c.bf16 %v460_v17, %v459_v16  ;;  %v461_v19 = vld [vmem:[#allocation8 + $0x40] sm:$0xff]  ;;  %v462_v20 = vld [vmem:[#allocation8 + $0x48] sm:$0xff]  ;;  %v808_v40 = vmov 2131351028   ;;  %v809_v43 = vmov 2102212464   ;;  %p774_p11 = scmp.lt.s32.totalorder %s554_s23, %s554_s23 }
  0x3c   :  { %651 = vmatprep.subr.bf16.mxu1 %v803_v4  ;;  %657 = vmatprep.subr.bf16.mxu0 %v803_v4  ;;  %v667_v21 = vpack.c.bf16 %v462_v20, %v461_v19  ;;  %v563_v22 = vld [vmem:[#allocation3] ss:$0 sm:$0xff]  ;;  %v810_v46 = vmov 920167782   ;;  %v811_v49 = vmov 1326507024  }
  0x3d   :  { %s769_s24 = scalar_lea.vmem %s554_s23, 128 }
  0x3e   :  { %p770_p10 = scmp.ne.s32.totalorder %s554_s23, %s769_s24  ;;  %p775_p12 = scmp.lt.s32.totalorder %s769_s24, %s769_s24 }
  0x3f   :  { %659 = vmatpush3.bf16.msra.mxu0 %v658_v12 }
  0x40   :  { %660 = vmatprep.subr.bf16.mxu0 %v803_v4  ;;  %p776_p13 = por %p775_p12, %p774_p11 }
  0x42   :  { %p777_p0 = pnand %p776_p13, %p770_p10 }
  0x43   :  { %662 = vmatpush3.bf16.msra.mxu0 %v661_v15 }
  0x44   :  { %663 = vmatprep.subr.bf16.mxu0 %v803_v4 }
  0x47   :  { %665 = vmatpush3.bf16.msra.mxu0 %v664_v18 }
  0x48   :  { %666 = vmatprep.subr.bf16.mxu0 %v803_v4 }
  0x4b   :  { %668 = vmatpush3.bf16.msra.mxu0 %v667_v21 }
  0x4c   :  { %669 = vmatprep.subr.bf16.mxu0 %v803_v4 }
  0xb8   :  { %v75_v23 = vpop.permute.xlu0 %74 }
  0xb9   :  { %v910_v24 = vmul.f32 %v563_v22, %v75_v23 }
  0xbb   :  { %v87_v25 = vand.u32 2139095040, %v910_v24  ;;  %v84_v29 = vand.u32 2147483647, %v910_v24  ;;  %vm86_vm8 = vcmp.lt.s32.totalorder %v910_v24, 0 }
  0xbd   :  { %v88_v26 = vshrl.u32 %v87_v25, 23  ;;  %v91_v32 = vand.u32 8388607, %v84_v29  ;;  %vm85_vm9 = vcmp.le.f32.partialorder %v84_v29, 0.7853982 }
  0xbf   :  { %v564_v27 = vadd.s32 4294967169, %v88_v26  ;;  %v92_v51 = vor.u32 8388608, %v91_v32 }
  0xc1   :  { %v94_v28 = vadd.s32 1, %v564_v27  ;;  %v132_v1 = vshll.u32 %v92_v51, 8 }
  0xc3   :  { %vm95_vm1 = vcmp.gt.s32.totalorder %v94_v28, 0 }
  0xc4   :  { %v96_v30 = vsel %vm95_vm1, %v94_v28, 0  ;;  %vm176_vm1 = vweird.f32 %v910_v24 }
  0xc5   :  { %v98_v31 = vand.u32 31, %v96_v30  ;;  %v97_v34 = vshrl.u32 %v96_v30, 5 }
  0xc7   :  { %v99_v33 = vsub.s32 32, %v98_v31  ;;  %v101_v36 = vshll.u32 %v806_v35, %v98_v31  ;;  %v104_v38 = vshll.u32 %v807_v37, %v98_v31  ;;  %v107_v42 = vshll.u32 %v808_v40, %v98_v31 }
  0xc8   :  { %v110_v45 = vshll.u32 %v809_v43, %v98_v31  ;;  %v113_v48 = vshll.u32 %v810_v46, %v98_v31  ;;  %vm116_vm2 = vcmp.lt.s32.totalorder %v97_v34, 1  ;;  %vm119_vm3 = vcmp.lt.s32.totalorder %v97_v34, 4 }
  0xc9   :  { %v102_v39 = vshrl.u32 %v807_v37, %v99_v33  ;;  %v105_v41 = vshrl.u32 %v808_v40, %v99_v33  ;;  %v108_v44 = vshrl.u32 %v809_v43, %v99_v33  ;;  %v111_v47 = vshrl.u32 %v810_v46, %v99_v33 }
  0xca   :  { %v114_v50 = vshrl.u32 %v811_v49, %v99_v33  ;;  %v100_v60 = vshrl.u32 %v806_v35, %v99_v33  ;;  %vm118_vm4 = vcmp.lt.s32.totalorder %v97_v34, 3  ;;  %vm117_vm5 = vcmp.lt.s32.totalorder %v97_v34, 2  ;;  %v291_v49 = vld [vmem:[%s963_s2] sm:$0xff] }
  0xcb   :  { %v103_v52 = vor.u32 %v102_v39, %v101_v36  ;;  %v106_v53 = vor.u32 %v105_v41, %v104_v38  ;;  %v109_v54 = vor.u32 %v108_v44, %v107_v42  ;;  %v112_v55 = vor.u32 %v111_v47, %v110_v45 }
  0xcc   :  { %v115_v56 = vor.u32 %v114_v50, %v113_v48  ;;  %v292_v50 = vld [vmem:[%s963_s2 + $0x8] sm:$0xff] }
  0xcd   :  { %v121_v57 = vsel %vm119_vm3, %v109_v54, 2102212464  ;;  %v124_v58 = vsel %vm116_vm2, %v103_v52, %v106_v53  ;;  %v128_v59 = vsel %vm116_vm2, %v106_v53, %v109_v54  ;;  %v125_v61 = vsel %vm119_vm3, %v112_v55, 920167782 }
  0xce   :  { %v129_v62 = vsel %vm119_vm3, %v115_v56, 1326507024  ;;  %v126_v63 = vsel %vm118_vm4, %v109_v54, %v125_v61  ;;  %v120_v2 = vsel %vm116_vm2, %v100_v60, %v103_v52  ;;  %v122_v3 = vsel %vm118_vm4, %v106_v53, %v121_v57 }
  0xcf   :  { %v130_v0 = vsel %vm118_vm4, %v112_v55, %v129_v62  ;;  %v127_v5 = vsel %vm117_vm5, %v124_v58, %v126_v63  ;;  %v123_v12 = vsel %vm117_vm5, %v120_v2, %v122_v3  ;;  %v652_v54 = vpack.c.bf16 %v292_v50, %v291_v49  ;;  %v463_v63 = vld [vmem:[#allocation8 + $0x50] sm:$0xff]  ;;  %v466_v2 = vld [vmem:[#allocation8 + $0x68] sm:$0xff] }
  0xd0   :  { %v131_v7 = vsel %vm117_vm5, %v128_v59, %v130_v0  ;;  %v919_v10 = vmul.u32.u64.low %v132_v1, %v127_v5  ;;  %v920_v11 = vmul.u32.u64.high %v132_v1, %v127_v5, %v919_v10  ;;  %v139_v14 = vmul.u32 %v132_v1, %v123_v12  ;;  %v464_v0 = vld [vmem:[#allocation8 + $0x58] sm:$0xff]  ;;  %v467_v5 = vld [vmem:[#allocation8 + $0x70] sm:$0xff] }
  0xd1   :  { %v916_v8 = vmul.u32.u64.low %v132_v1, %v131_v7  ;;  %v917_v9 = vmul.u32.u64.high %v132_v1, %v131_v7, %v916_v8  ;;  %v670_v1 = vpack.c.bf16 %v464_v0, %v463_v63  ;;  %v468_v7 = vld [vmem:[#allocation8 + $0x78] sm:$0xff] }
  0xd2   :  { %v142_v13 = vadd.s32 1, %v920_v11  ;;  %v676_v8 = vpack.c.bf16 %v468_v7, %v467_v5 }
  0xd3   :  { %vm141_vm6 = vc.u32 %v917_v9, %v919_v10  ;;  %v140_v27 = vadd.s32 %v919_v10, %v917_v9  ;;  %671 = vmatpush3.bf16.msra.mxu0 %v670_v1 }
  0xd4   :  { %v143_v15 = vsel %vm141_vm6, %v142_v13, %v920_v11  ;;  %672 = vmatprep.subr.bf16.mxu0 %v803_v4  ;;  %v574_v11 = vld [vmem:[%s965_s4] ss:$0 sm:$0xff] }
  0xd5   :  { %v144_v16 = vadd.s32 %v143_v15, %v139_v14 }
  0xd7   :  { %v145_v17 = vadd.s32 536870912, %v144_v16 }
  0xd9   :  { %v146_v18 = vshrl.u32 %v145_v17, 30 }
  0xdb   :  { %v147_v19 = vshll.u32 %v146_v18, 30  ;;  %v170_v40 = vsub.s32 4, %v146_v18 }
  0xdd   :  { %v148_v20 = vsub.s32 %v144_v16, %v147_v19  ;;  %v171_v44 = vsel %vm86_vm8, %v170_v40, %v146_v18 }
  0xde   :  { %v173_v45 = vsel %vm85_vm9, 0, %v171_v44 }
  0xdf   :  { %v150_v21 = vsub.s32 0, %v148_v20  ;;  %v177_v46 = vadd.s32 3, %v173_v45  ;;  %v281_v47 = vand.u32 3, %v173_v45 }
  0xe1   :  { %v565_v22 = vmin.u32 %v150_v21, %v148_v20  ;;  %v178_v48 = vand.u32 3, %v177_v46  ;;  %vm286_vm10 = vcmp.eq.s32.totalorder %v281_v47, 2  ;;  %vm283_vm14 = vcmp.eq.s32.totalorder %v281_v47, 0 }
  0xe2   :  { %vm282_vm15 = vcmp.lt.s32.totalorder %v281_v47, 2 }
  0xe3   :  { %v152_v23 = vclz %v565_v22  ;;  %vm180_vm12 = vcmp.eq.s32.totalorder %v178_v48, 0  ;;  %vm183_vm13 = vcmp.eq.s32.totalorder %v178_v48, 2  ;;  %vm179_vm2 = vcmp.lt.s32.totalorder %v178_v48, 2 }
  0xe5   :  { %v566_v25 = vadd.s32 4294967294, %v152_v23 }
  0xe7   :  { %vm567_vm7 = vcmp.lt.s32.totalorder %v566_v25, 0 }
  0xe8   :  { %v155_v26 = vsel %vm567_vm7, 0, %v566_v25 }
  0xe9   :  { %v156_v28 = vsub.s32 32, %v155_v26  ;;  %v160_v30 = vsub.s32 4294967266, %v155_v26  ;;  %v157_v31 = vshll.u32 %v148_v20, %v155_v26 }
  0xeb   :  { %v158_v32 = vshrl.u32 %v140_v27, %v156_v28  ;;  %v161_v33 = vadd.s32 127, %v160_v30 }
  0xed   :  { %v159_v34 = vor.u32 %v158_v32, %v157_v31  ;;  %v162_v35 = vshll.u32 %v161_v33, 23 }
  0xef   :  { %v163_v36 = vor.u32 4788187, %v162_v35  ;;  %v166_v38 = vcvt.s32.f32 %v159_v34 }
  0xf1   :  { %v164_v37 = vand.u32 2147483647, %v163_v36 }
  0xf3   :  { %v167_v39 = vmul.f32 %v166_v38, %v164_v37 }
  0xf5   :  { %v168_v41 = vxor.u32 2147483648, %v167_v39 }
  0xf7   :  { %v169_v42 = vsel %vm86_vm8, %v168_v41, %v167_v39 }
  0xf8   :  { %v172_v43 = vsel %vm85_vm9, %v910_v24, %v169_v42  ;;  %v465_v24 = vld [vmem:[#allocation8 + $0x60] sm:$0xff] }
  0xf9   :  { %699 = vcosq.f32 %v172_v43  ;;  %v673_v3 = vpack.c.bf16 %v466_v2, %v465_v24 }
  0xfa   :  { %701 = vsinq.f32 %v172_v43 }
  0xfb   :  { %674 = vmatpush3.bf16.msra.mxu0 %v673_v3 }
  0xfc   :  { %675 = vmatprep.subr.bf16.mxu0 %v803_v4  ;;  %v575_v4 = vld [vmem:[%s967_s6] ss:$0 sm:$0xff] }
  0xff   :  { %677 = vmatpush3.bf16.msra.mxu0 %v676_v8 }
 0x103   :  { %v700_v51 = vpop.eup %699 }
 0x104   :  { %v702_v29 = vpop.eup %701  ;;  %v184_v52 = vxor.u32 2147483648, %v700_v51 }
 0x105   :  { %v181_v53 = vxor.u32 2147483648, %v702_v29 }
 0x106   :  { %v288_v55 = vsel %vm286_vm10, %v184_v52, %v702_v29  ;;  %v185_v57 = vsel %vm183_vm13, %v184_v52, %v702_v29 }
 0x107   :  { %v182_v56 = vsel %vm180_vm12, %v700_v51, %v181_v53  ;;  %v285_v58 = vsel %vm283_vm14, %v700_v51, %v181_v53 }
 0x108   :  { %v289_v59 = vsel %vm282_vm15, %v285_v58, %v288_v55  ;;  %v186_v61 = vsel %vm179_vm2, %v182_v56, %v185_v57 }
 0x109   :  { %v290_v60 = vsel %vm176_vm1, nan, %v289_v59  ;;  %v187_v62 = vsel %vm176_vm1, nan, %v186_v61 }
 0x10a   :  { %604 = vmatmul.mubr.msk.f32.vlgmr.msra.gmra.mrb[0].mxu1 %vm295_vm11, %v290_v60 }
 0x10b   :  { %653 = vmatpush3.bf16.msra.mxu1 %v652_v54  ;;  %610 = vmatprep.mubr.msk.f32.mxu1 %vm804_vm0, %v805_v6 }
 0x10e   :  { %611 = vmatmul.mubr.msk.f32.vlgmr.msra.gmra.mrb[2].mxu1 %vm295_vm11, %v187_v62 }
 0x1dd   :  { %v365_v6 = vpop.f32.mrb[0].mxu1 }
 0x1de   :  { %v605_v9 = vpop.f32.mrb[1].mxu1 }
 0x1e1   :  { %v438_v10 = vpop.f32.mrb[2].mxu1 }
 0x1e2   :  { %v439_v12 = vadd.f32 %v438_v10, %v365_v6  ;;  %v612_v13 = vpop.f32.mrb[3].mxu1 }
 0x1e4   :  { %v449_v14 = vadd.f32 %v574_v11, %v439_v12 }
 0x1e6   :  { %v450_v15 = vmax.f32 %v449_v14, 0.0 }
 0x1e8   :  { %646 = vmatmul.mubr.f32.vlgmr.msra.gmra.mrb[0].mxu0 %v450_v15 }
 0x2bb   :  { %v542_v16 = vpop.f32.mrb[0].mxu0 }
 0x2bc   :  { %v543_v17 = vadd.f32 %v575_v4, %v542_v16  ;;  %v647_v18 = vpop.f32.mrb[1].mxu0 }
 0x2be   :  { %546 = vst [vmem:[#allocation9] sm:$0xff] %v543_v17 }
 0x2bf   :  { %780 = shalt.err (!%p777_p0)
}
 0x2c0   :  { %s781_s3 = scalar_lea.hbm %s968_s7, 128 }
 0x2c1   :  { %p782_p1 = scmp.ne.s32.totalorder %s968_s7, %s781_s3  ;;  %p785_p2 = scmp.lt.u32.totalorder %s781_s3, %s968_s7 }
 0x2c3   :  { %p787_p3 = pnand %p785_p2, %p782_p1 }
 0x2c5   :  { %790 = shalt.err (!%p787_p3)
}
 0x2c6   :  { %556 = dma.vmem_to_hbm [thread:$0]  %s554_s23, 128, %s968_s7, [#allocation5]  }
 0x2c7   :  { %795 = dma.done.wait [#allocation5], 128  }
 0x2c8   :  { %796 = vsyncadd [#allocation5], 4294967168 }
 0x2c9   :  { %560 = vsyncpa [#allocation4], 1 }
 0x2ca   :  { %561 = vsyncpa [#allocation7], 1 }
 0x2cb   :  { %562 = vsyncpa [#allocation5], 1 }

</bundles_post_ra>
